<compile_context>
chip_gen: v5e
topology: v5e:2x2
jax: 0.10.0
libtpu: 0.0.40
codegen_flags: <defaults>
</compile_context>

<pallas_src>
import jax
import jax.numpy as jnp
from jax.experimental import pallas as pl
from jax.experimental.pallas import tpu as pltpu


def _round_up(v, m):
    return ((v + m - 1) // m) * m


def lstm_recurrence_kernel(x_ref, wih_ref, whh_ref, b_ref, out_ref, gates_sc):
    """Single grid step.
      x_ref:    (T*Bp, D)      time-major input, batch zero-padded to Bp (mult. of 8), matmul dtype
      wih_ref:  (D, 4H)        W_ih^T, gate order [i, f, o, g], matmul dtype
      whh_ref:  (H, 4H)        W_hh^T, gate order [i, f, o, g], f32
      b_ref:    (1, 4H)        b_ih + b_hh, gate order [i, f, o, g], f32
      out_ref:  (Bp, H)        h_T (last-step hidden state), f32
      gates_sc: ((T-1)*Bp, 4H) f32 scratch holding input projections for steps 1..T-1
    """
    Bp, H = out_ref.shape
    T = gates_sc.shape[0] // Bp + 1
    b = b_ref[...]

    def cell(pre, c):
        # pre: (Bp, 4H) f32 gate pre-activations, lane blocks [i | f | o | g]; c: (Bp, H) f32.
        sig = jax.nn.sigmoid(pre[:, : 3 * H])            # one EUP pass over [i, f, o]
        i_g = sig[:, 0 * H:1 * H]
        f_g = sig[:, 1 * H:2 * H]
        o_g = sig[:, 2 * H:3 * H]
        g_g = jnp.tanh(pre[:, 3 * H:])                   # one EUP pass over [g]
        c_new = f_g * c + i_g * g_g
        h_new = o_g * jnp.tanh(c_new)
        return h_new, c_new

    # ---- Phase 1a: project t=0 into a local value (no scratch dependency), so the serial
    #      recurrence can start while the bulk projection below is still in flight.
    g0 = jnp.dot(x_ref[pl.ds(0, Bp), :], wih_ref[...],
                 preferred_element_type=jnp.float32) + b

    # ---- Phase 1b: one MXU pass projects steps 1..T-1 into VMEM scratch (bias folded in).
    gates_sc[...] = jnp.dot(x_ref[pl.ds(Bp, (T - 1) * Bp), :], wih_ref[...],
                            preferred_element_type=jnp.float32) + b

    # ---- Step 0: h = c = 0, so the recurrent term vanishes (c = i*g, h = o*tanh(c)).
    sig0 = jax.nn.sigmoid(g0[:, : 3 * H])
    c = sig0[:, 0 * H:1 * H] * jnp.tanh(g0[:, 3 * H:])
    h = sig0[:, 2 * H:3 * H] * jnp.tanh(c)

    # ---- Steps 1..T-1: only a tiny (Bp, H) @ (H, 4H) f32 dot sits on the serial path.
    def body(step, carry):
        h, c = carry
        row = pl.multiple_of(step * Bp, 8)               # sublane-aligned dynamic slice
        pre = gates_sc[pl.ds(row, Bp), :] + jnp.dot(
            h, whh_ref[...], preferred_element_type=jnp.float32)
        return cell(pre, c)

    h, c = jax.lax.fori_loop(0, T - 1, body, (h, c), unroll=True)

    # NOTE: padded batch rows (B..Bp) carry garbage h (they see the fused bias); this is benign
    # because nothing reduces over batch inside the kernel and the wrapper strips those rows.
    out_ref[...] = h.astype(out_ref.dtype)


def pack_temporal_lstm_params(w_ih, w_hh, b_ih, b_hh, matmul_dtype=jnp.float32):
    """One-time repack of PyTorch nn.LSTM parameters (hoisted out of the per-call path).
    w_ih: (4H, D), w_hh: (4H, H), b_ih/b_hh: (4H,), PyTorch gate order [i, f, g, o].
    Returns (W_ih^T, W_hh^T, fused bias) with gate order [i, f, o, g] along the 4H axis.
    matmul_dtype=jnp.bfloat16 halves x/W_ih DMA bytes on every TPU generation (v5e/v6e/v7x MXUs
    all take bf16 operands); the recurrent weights always stay f32."""
    H = w_hh.shape[1]
    perm = jnp.concatenate([jnp.arange(0, H), jnp.arange(H, 2 * H),
                            jnp.arange(3 * H, 4 * H), jnp.arange(2 * H, 3 * H)])
    wih_p = jnp.transpose(w_ih[perm, :]).astype(matmul_dtype)      # (D, 4H)
    whh_p = jnp.transpose(w_hh[perm, :]).astype(jnp.float32)       # (H, 4H), f32 recurrent path
    b_p = (b_ih + b_hh)[perm].astype(jnp.float32).reshape(1, 4 * H)
    return wih_p, whh_p, b_p


def temporal_module_forward(x, packed_params):
    """x: (B, T, D) float (batch_first, like nn.LSTM(batch_first=True)).
    Returns output[:, -1, :] == h_T, shape (B, H), in x.dtype."""
    wih_p, whh_p, b_p = packed_params
    B, T, D = x.shape
    H = whh_p.shape[0]
    assert T >= 2, "kernel assumes at least 2 time steps (module uses 10-frame sequences)"

    Bp = _round_up(B, 8)          # sublane-aligned batch; D and H are left un-padded.

    # Time-major, batch zero-padded, flattened to (T*Bp, D) for the bulk input projection.
    x_tbd = jnp.transpose(x, (1, 0, 2)).astype(wih_p.dtype)
    x2d = jnp.zeros((T, Bp, D), wih_p.dtype).at[:, :B, :].set(x_tbd).reshape(T * Bp, D)

    out = pl.pallas_call(
        lstm_recurrence_kernel,
        out_shape=jax.ShapeDtypeStruct((Bp, H), jnp.float32),
        grid_spec=pltpu.PrefetchScalarGridSpec(
            num_scalar_prefetch=0,
            grid=(1,),                                          # recurrence handled in-kernel
            in_specs=[
                pl.BlockSpec((T * Bp, D), lambda i: (0, 0)),    # whole sequence resident
                pl.BlockSpec((D, 4 * H), lambda i: (0, 0)),     # W_ih^T
                pl.BlockSpec((H, 4 * H), lambda i: (0, 0)),     # W_hh^T
                pl.BlockSpec((1, 4 * H), lambda i: (0, 0)),     # fused bias
            ],
            out_specs=pl.BlockSpec((Bp, H), lambda i: (0, 0)),
            scratch_shapes=[
                pltpu.VMEM(((T - 1) * Bp, 4 * H), jnp.float32),  # steps 1..T-1 pre-activations
            ],
        ),
        compiler_params=pltpu.CompilerParams(
            dimension_semantics=("arbitrary",),
        ),
    )(x2d, wih_p, whh_p, b_p)

    return out[:B, :].astype(x.dtype)                            # strip batch padding


def _reference_lstm_last(x, w_ih, w_hh, b_ih, b_hh):
    """Pure-JAX reference matching torch.nn.LSTM forward (gate order i, f, g, o)."""
    B, T, D = x.shape
    H = w_hh.shape[1]
    h = jnp.zeros((B, H), jnp.float32)
    c = jnp.zeros((B, H), jnp.float32)

    def step(carry, x_t):
        h, c = carry
        gates = x_t @ w_ih.T + h @ w_hh.T + b_ih + b_hh
        i = jax.nn.sigmoid(gates[:, 0 * H:1 * H])
        f = jax.nn.sigmoid(gates[:, 1 * H:2 * H])
        g = jnp.tanh(gates[:, 2 * H:3 * H])
        o = jax.nn.sigmoid(gates[:, 3 * H:4 * H])
        c = f * c + i * g
        h = o * jnp.tanh(c)
        return (h, c), None

    (h, _), _ = jax.lax.scan(step, (h, c), jnp.transpose(x, (1, 0, 2)))
    return h


if __name__ == "__main__":
    # Small shapes consistent with the module: 10-frame sequences of feature vectors.
    B, T, D, H = 2, 10, 32, 32

    key = jax.random.PRNGKey(0)
    kx, k1, k2, k3, k4 = jax.random.split(key, 5)

    # PyTorch-style init: U(-1/sqrt(H), 1/sqrt(H)).
    bound = 1.0 / jnp.sqrt(jnp.float32(H))
    x = jax.random.normal(kx, (B, T, D), dtype=jnp.float32)
    w_ih = jax.random.uniform(k1, (4 * H, D), jnp.float32, -bound, bound)
    w_hh = jax.random.uniform(k2, (4 * H, H), jnp.float32, -bound, bound)
    b_ih = jax.random.uniform(k3, (4 * H,), jnp.float32, -bound, bound)
    b_hh = jax.random.uniform(k4, (4 * H,), jnp.float32, -bound, bound)

    ref = _reference_lstm_last(x, w_ih, w_hh, b_ih, b_hh)

    # f32 matmul path (matches the reference).
    params_f32 = pack_temporal_lstm_params(w_ih, w_hh, b_ih, b_hh)
    out = jax.block_until_ready(temporal_module_forward(x, params_f32))
    assert out.shape == (B, H)
    assert jnp.allclose(out, ref, atol=1e-5, rtol=1e-5)

    # bf16 input-projection path (recurrent path stays f32; valid on v5e/v6e/v7x).
    params_bf16 = pack_temporal_lstm_params(w_ih, w_hh, b_ih, b_hh, matmul_dtype=jnp.bfloat16)
    out_bf16 = jax.block_until_ready(temporal_module_forward(x, params_bf16))
    assert jnp.allclose(out_bf16, ref, atol=2e-2, rtol=2e-2)

    print("KERNEL_OK")
</pallas_src>

<mosaic_0001>
module attributes {stable_mosaic.version = 11 : i64} {
  func.func @lstm_recurrence_kernel(%arg0: i32, %arg1: memref<80x32xf32, #tpu.memory_space<vmem>>, %arg2: memref<32x128xf32, #tpu.memory_space<vmem>>, %arg3: memref<32x128xf32, #tpu.memory_space<vmem>>, %arg4: memref<1x128xf32, #tpu.memory_space<vmem>>, %arg5: memref<8x32xf32, #tpu.memory_space<vmem>>, %arg6: memref<72x128xf32, #tpu.memory_space<vmem>>) attributes {dimension_semantics = [#tpu.dimension_semantics<arbitrary>], iteration_bounds = array<i64: 1>, scalar_prefetch = 0 : i64, scratch_operands = 1 : i64, tpu.core_type = #tpu.core_type<tc>, window_params = [{pipeline_mode = #tpu.pipeline_mode<synchronous>, transform_indices = @transform_0, window_bounds = array<i64: 80, 32>}, {pipeline_mode = #tpu.pipeline_mode<synchronous>, transform_indices = @transform_1, window_bounds = array<i64: 32, 128>}, {pipeline_mode = #tpu.pipeline_mode<synchronous>, transform_indices = @transform_2, window_bounds = array<i64: 32, 128>}, {pipeline_mode = #tpu.pipeline_mode<synchronous>, transform_indices = @transform_3, window_bounds = array<i64: 1, 128>}, {pipeline_mode = #tpu.pipeline_mode<synchronous>, transform_indices = @transform_4, window_bounds = array<i64: 8, 32>}]} {
    %c0 = arith.constant 0 : index
    %c0_0 = arith.constant 0 : index
    %0 = vector.load %arg4[%c0, %c0_0] : memref<1x128xf32, #tpu.memory_space<vmem>>, vector<1x128xf32>
    %c0_1 = arith.constant 0 : index
    %c0_2 = arith.constant 0 : index
    %1 = vector.load %arg1[%c0_1, %c0_2] : memref<80x32xf32, #tpu.memory_space<vmem>>, vector<8x32xf32>
    %c0_3 = arith.constant 0 : index
    %c0_4 = arith.constant 0 : index
    %2 = vector.load %arg2[%c0_3, %c0_4] : memref<32x128xf32, #tpu.memory_space<vmem>>, vector<32x128xf32>
    %cst = arith.constant dense<0.000000e+00> : vector<8x128xf32>
    %3 = tpu.matmul %1, %2, %cst {dimension_numbers = #tpu.dot_dimension_numbers<[1], [0], [0], [1], [0, 0, 1, 1], [], []>} : vector<8x32xf32>, vector<32x128xf32>, vector<8x128xf32> -> vector<8x128xf32>
    %4 = vector.broadcast %0 : vector<1x128xf32> to vector<8x128xf32>
    %5 = arith.addf %3, %4 : vector<8x128xf32>
    %c8 = arith.constant 8 : index
    %c0_5 = arith.constant 0 : index
    %6 = vector.load %arg1[%c8, %c0_5] : memref<80x32xf32, #tpu.memory_space<vmem>>, vector<72x32xf32>
    %c0_6 = arith.constant 0 : index
    %c0_7 = arith.constant 0 : index
    %7 = vector.load %arg2[%c0_6, %c0_7] : memref<32x128xf32, #tpu.memory_space<vmem>>, vector<32x128xf32>
    %cst_8 = arith.constant dense<0.000000e+00> : vector<72x128xf32>
    %8 = tpu.matmul %6, %7, %cst_8 {dimension_numbers = #tpu.dot_dimension_numbers<[1], [0], [0], [1], [0, 0, 1, 1], [], []>} : vector<72x32xf32>, vector<32x128xf32>, vector<72x128xf32> -> vector<72x128xf32>
    %9 = vector.broadcast %0 : vector<1x128xf32> to vector<72x128xf32>
    %10 = arith.addf %8, %9 : vector<72x128xf32>
    %c0_9 = arith.constant 0 : index
    %c0_10 = arith.constant 0 : index
    %11 = vector.load %arg6[%c0_9, %c0_10] : memref<72x128xf32, #tpu.memory_space<vmem>>, vector<72x128xf32>
    tpu.vector_store %arg6[%c0_9, %c0_10], %10 {strides = array<i32>} : memref<72x128xf32, #tpu.memory_space<vmem>>, vector<72x128xf32>,
    %12 = vector.extract_strided_slice %5 {offsets = [0, 0], sizes = [8, 96], strides = [1, 1]} : vector<8x128xf32> to vector<8x96xf32>
    %13 = arith.negf %12 : vector<8x96xf32>
    %14 = math.exp %13 : vector<8x96xf32>
    %cst_11 = arith.constant 1.000000e+00 : f32
    %15 = vector.broadcast %cst_11 : f32 to vector<8x96xf32>
    %16 = arith.addf %15, %14 : vector<8x96xf32>
    %17 = arith.divf %15, %16 : vector<8x96xf32>
    %18 = vector.extract_strided_slice %17 {offsets = [0, 0], sizes = [8, 32], strides = [1, 1]} : vector<8x96xf32> to vector<8x32xf32>
    %19 = vector.extract_strided_slice %5 {offsets = [0, 96], sizes = [8, 32], strides = [1, 1]} : vector<8x128xf32> to vector<8x32xf32>
    %20 = math.tanh %19 : vector<8x32xf32>
    %21 = arith.mulf %18, %20 : vector<8x32xf32>
    %22 = vector.extract_strided_slice %17 {offsets = [0, 64], sizes = [8, 32], strides = [1, 1]} : vector<8x96xf32> to vector<8x32xf32>
    %23 = math.tanh %21 : vector<8x32xf32>
    %24 = arith.mulf %22, %23 : vector<8x32xf32>
    %c0_i32 = arith.constant 0 : i32
    %c8_i32 = arith.constant 8 : i32
    %25 = arith.muli %c0_i32, %c8_i32 : i32
    %26 = tpu.assume_multiple %25, 8 : i32
    %27 = arith.index_cast %26 : i32 to index
    %c0_12 = arith.constant 0 : index
    %28 = vector.load %arg6[%27, %c0_12] : memref<72x128xf32, #tpu.memory_space<vmem>>, vector<8x128xf32>
    %c0_13 = arith.constant 0 : index
    %c0_14 = arith.constant 0 : index
    %29 = vector.load %arg3[%c0_13, %c0_14] : memref<32x128xf32, #tpu.memory_space<vmem>>, vector<32x128xf32>
    %cst_15 = arith.constant dense<0.000000e+00> : vector<8x128xf32>
    %30 = tpu.matmul %24, %29, %cst_15 {dimension_numbers = #tpu.dot_dimension_numbers<[1], [0], [0], [1], [0, 0, 1, 1], [], []>} : vector<8x32xf32>, vector<32x128xf32>, vector<8x128xf32> -> vector<8x128xf32>
    %31 = arith.addf %28, %30 : vector<8x128xf32>
    %32 = vector.extract_strided_slice %31 {offsets = [0, 0], sizes = [8, 96], strides = [1, 1]} : vector<8x128xf32> to vector<8x96xf32>
    %33 = arith.negf %32 : vector<8x96xf32>
    %34 = math.exp %33 : vector<8x96xf32>
    %cst_16 = arith.constant 1.000000e+00 : f32
    %35 = vector.broadcast %cst_16 : f32 to vector<8x96xf32>
    %36 = arith.addf %35, %34 : vector<8x96xf32>
    %37 = arith.divf %35, %36 : vector<8x96xf32>
    %38 = vector.extract_strided_slice %37 {offsets = [0, 0], sizes = [8, 32], strides = [1, 1]} : vector<8x96xf32> to vector<8x32xf32>
    %39 = vector.extract_strided_slice %37 {offsets = [0, 32], sizes = [8, 32], strides = [1, 1]} : vector<8x96xf32> to vector<8x32xf32>
    %40 = vector.extract_strided_slice %37 {offsets = [0, 64], sizes = [8, 32], strides = [1, 1]} : vector<8x96xf32> to vector<8x32xf32>
    %41 = vector.extract_strided_slice %31 {offsets = [0, 96], sizes = [8, 32], strides = [1, 1]} : vector<8x128xf32> to vector<8x32xf32>
    %42 = math.tanh %41 : vector<8x32xf32>
    %43 = arith.mulf %39, %21 : vector<8x32xf32>
    %44 = arith.mulf %38, %42 : vector<8x32xf32>
    %45 = arith.addf %43, %44 : vector<8x32xf32>
    %46 = math.tanh %45 : vector<8x32xf32>
    %47 = arith.mulf %40, %46 : vector<8x32xf32>
    %c1_i32 = arith.constant 1 : i32
    %c8_i32_17 = arith.constant 8 : i32
    %48 = arith.muli %c1_i32, %c8_i32_17 : i32
    %49 = tpu.assume_multiple %48, 8 : i32
    %50 = arith.index_cast %49 : i32 to index
    %c0_18 = arith.constant 0 : index
    %51 = vector.load %arg6[%50, %c0_18] : memref<72x128xf32, #tpu.memory_space<vmem>>, vector<8x128xf32>
    %c0_19 = arith.constant 0 : index
    %c0_20 = arith.constant 0 : index
    %52 = vector.load %arg3[%c0_19, %c0_20] : memref<32x128xf32, #tpu.memory_space<vmem>>, vector<32x128xf32>
    %cst_21 = arith.constant dense<0.000000e+00> : vector<8x128xf32>
    %53 = tpu.matmul %47, %52, %cst_21 {dimension_numbers = #tpu.dot_dimension_numbers<[1], [0], [0], [1], [0, 0, 1, 1], [], []>} : vector<8x32xf32>, vector<32x128xf32>, vector<8x128xf32> -> vector<8x128xf32>
    %54 = arith.addf %51, %53 : vector<8x128xf32>
    %55 = vector.extract_strided_slice %54 {offsets = [0, 0], sizes = [8, 96], strides = [1, 1]} : vector<8x128xf32> to vector<8x96xf32>
    %56 = arith.negf %55 : vector<8x96xf32>
    %57 = math.exp %56 : vector<8x96xf32>
    %cst_22 = arith.constant 1.000000e+00 : f32
    %58 = vector.broadcast %cst_22 : f32 to vector<8x96xf32>
    %59 = arith.addf %58, %57 : vector<8x96xf32>
    %60 = arith.divf %58, %59 : vector<8x96xf32>
    %61 = vector.extract_strided_slice %60 {offsets = [0, 0], sizes = [8, 32], strides = [1, 1]} : vector<8x96xf32> to vector<8x32xf32>
    %62 = vector.extract_strided_slice %60 {offsets = [0, 32], sizes = [8, 32], strides = [1, 1]} : vector<8x96xf32> to vector<8x32xf32>
    %63 = vector.extract_strided_slice %60 {offsets = [0, 64], sizes = [8, 32], strides = [1, 1]} : vector<8x96xf32> to vector<8x32xf32>
    %64 = vector.extract_strided_slice %54 {offsets = [0, 96], sizes = [8, 32], strides = [1, 1]} : vector<8x128xf32> to vector<8x32xf32>
    %65 = math.tanh %64 : vector<8x32xf32>
    %66 = arith.mulf %62, %45 : vector<8x32xf32>
    %67 = arith.mulf %61, %65 : vector<8x32xf32>
    %68 = arith.addf %66, %67 : vector<8x32xf32>
    %69 = math.tanh %68 : vector<8x32xf32>
    %70 = arith.mulf %63, %69 : vector<8x32xf32>
    %c2_i32 = arith.constant 2 : i32
    %c8_i32_23 = arith.constant 8 : i32
    %71 = arith.muli %c2_i32, %c8_i32_23 : i32
    %72 = tpu.assume_multiple %71, 8 : i32
    %73 = arith.index_cast %72 : i32 to index
    %c0_24 = arith.constant 0 : index
    %74 = vector.load %arg6[%73, %c0_24] : memref<72x128xf32, #tpu.memory_space<vmem>>, vector<8x128xf32>
    %c0_25 = arith.constant 0 : index
    %c0_26 = arith.constant 0 : index
    %75 = vector.load %arg3[%c0_25, %c0_26] : memref<32x128xf32, #tpu.memory_space<vmem>>, vector<32x128xf32>
    %cst_27 = arith.constant dense<0.000000e+00> : vector<8x128xf32>
    %76 = tpu.matmul %70, %75, %cst_27 {dimension_numbers = #tpu.dot_dimension_numbers<[1], [0], [0], [1], [0, 0, 1, 1], [], []>} : vector<8x32xf32>, vector<32x128xf32>, vector<8x128xf32> -> vector<8x128xf32>
    %77 = arith.addf %74, %76 : vector<8x128xf32>
    %78 = vector.extract_strided_slice %77 {offsets = [0, 0], sizes = [8, 96], strides = [1, 1]} : vector<8x128xf32> to vector<8x96xf32>
    %79 = arith.negf %78 : vector<8x96xf32>
    %80 = math.exp %79 : vector<8x96xf32>
    %cst_28 = arith.constant 1.000000e+00 : f32
    %81 = vector.broadcast %cst_28 : f32 to vector<8x96xf32>
    %82 = arith.addf %81, %80 : vector<8x96xf32>
    %83 = arith.divf %81, %82 : vector<8x96xf32>
    %84 = vector.extract_strided_slice %83 {offsets = [0, 0], sizes = [8, 32], strides = [1, 1]} : vector<8x96xf32> to vector<8x32xf32>
    %85 = vector.extract_strided_slice %83 {offsets = [0, 32], sizes = [8, 32], strides = [1, 1]} : vector<8x96xf32> to vector<8x32xf32>
    %86 = vector.extract_strided_slice %83 {offsets = [0, 64], sizes = [8, 32], strides = [1, 1]} : vector<8x96xf32> to vector<8x32xf32>
    %87 = vector.extract_strided_slice %77 {offsets = [0, 96], sizes = [8, 32], strides = [1, 1]} : vector<8x128xf32> to vector<8x32xf32>
    %88 = math.tanh %87 : vector<8x32xf32>
    %89 = arith.mulf %85, %68 : vector<8x32xf32>
    %90 = arith.mulf %84, %88 : vector<8x32xf32>
    %91 = arith.addf %89, %90 : vector<8x32xf32>
    %92 = math.tanh %91 : vector<8x32xf32>
    %93 = arith.mulf %86, %92 : vector<8x32xf32>
    %c3_i32 = arith.constant 3 : i32
    %c8_i32_29 = arith.constant 8 : i32
    %94 = arith.muli %c3_i32, %c8_i32_29 : i32
    %95 = tpu.assume_multiple %94, 8 : i32
    %96 = arith.index_cast %95 : i32 to index
    %c0_30 = arith.constant 0 : index
    %97 = vector.load %arg6[%96, %c0_30] : memref<72x128xf32, #tpu.memory_space<vmem>>, vector<8x128xf32>
    %c0_31 = arith.constant 0 : index
    %c0_32 = arith.constant 0 : index
    %98 = vector.load %arg3[%c0_31, %c0_32] : memref<32x128xf32, #tpu.memory_space<vmem>>, vector<32x128xf32>
    %cst_33 = arith.constant dense<0.000000e+00> : vector<8x128xf32>
    %99 = tpu.matmul %93, %98, %cst_33 {dimension_numbers = #tpu.dot_dimension_numbers<[1], [0], [0], [1], [0, 0, 1, 1], [], []>} : vector<8x32xf32>, vector<32x128xf32>, vector<8x128xf32> -> vector<8x128xf32>
    %100 = arith.addf %97, %99 : vector<8x128xf32>
    %101 = vector.extract_strided_slice %100 {offsets = [0, 0], sizes = [8, 96], strides = [1, 1]} : vector<8x128xf32> to vector<8x96xf32>
    %102 = arith.negf %101 : vector<8x96xf32>
    %103 = math.exp %102 : vector<8x96xf32>
    %cst_34 = arith.constant 1.000000e+00 : f32
    %104 = vector.broadcast %cst_34 : f32 to vector<8x96xf32>
    %105 = arith.addf %104, %103 : vector<8x96xf32>
    %106 = arith.divf %104, %105 : vector<8x96xf32>
    %107 = vector.extract_strided_slice %106 {offsets = [0, 0], sizes = [8, 32], strides = [1, 1]} : vector<8x96xf32> to vector<8x32xf32>
    %108 = vector.extract_strided_slice %106 {offsets = [0, 32], sizes = [8, 32], strides = [1, 1]} : vector<8x96xf32> to vector<8x32xf32>
    %109 = vector.extract_strided_slice %106 {offsets = [0, 64], sizes = [8, 32], strides = [1, 1]} : vector<8x96xf32> to vector<8x32xf32>
    %110 = vector.extract_strided_slice %100 {offsets = [0, 96], sizes = [8, 32], strides = [1, 1]} : vector<8x128xf32> to vector<8x32xf32>
    %111 = math.tanh %110 : vector<8x32xf32>
    %112 = arith.mulf %108, %91 : vector<8x32xf32>
    %113 = arith.mulf %107, %111 : vector<8x32xf32>
    %114 = arith.addf %112, %113 : vector<8x32xf32>
    %115 = math.tanh %114 : vector<8x32xf32>
    %116 = arith.mulf %109, %115 : vector<8x32xf32>
    %c4_i32 = arith.constant 4 : i32
    %c8_i32_35 = arith.constant 8 : i32
    %117 = arith.muli %c4_i32, %c8_i32_35 : i32
    %118 = tpu.assume_multiple %117, 8 : i32
    %119 = arith.index_cast %118 : i32 to index
    %c0_36 = arith.constant 0 : index
    %120 = vector.load %arg6[%119, %c0_36] : memref<72x128xf32, #tpu.memory_space<vmem>>, vector<8x128xf32>
    %c0_37 = arith.constant 0 : index
    %c0_38 = arith.constant 0 : index
    %121 = vector.load %arg3[%c0_37, %c0_38] : memref<32x128xf32, #tpu.memory_space<vmem>>, vector<32x128xf32>
    %cst_39 = arith.constant dense<0.000000e+00> : vector<8x128xf32>
    %122 = tpu.matmul %116, %121, %cst_39 {dimension_numbers = #tpu.dot_dimension_numbers<[1], [0], [0], [1], [0, 0, 1, 1], [], []>} : vector<8x32xf32>, vector<32x128xf32>, vector<8x128xf32> -> vector<8x128xf32>
    %123 = arith.addf %120, %122 : vector<8x128xf32>
    %124 = vector.extract_strided_slice %123 {offsets = [0, 0], sizes = [8, 96], strides = [1, 1]} : vector<8x128xf32> to vector<8x96xf32>
    %125 = arith.negf %124 : vector<8x96xf32>
    %126 = math.exp %125 : vector<8x96xf32>
    %cst_40 = arith.constant 1.000000e+00 : f32
    %127 = vector.broadcast %cst_40 : f32 to vector<8x96xf32>
    %128 = arith.addf %127, %126 : vector<8x96xf32>
    %129 = arith.divf %127, %128 : vector<8x96xf32>
    %130 = vector.extract_strided_slice %129 {offsets = [0, 0], sizes = [8, 32], strides = [1, 1]} : vector<8x96xf32> to vector<8x32xf32>
    %131 = vector.extract_strided_slice %129 {offsets = [0, 32], sizes = [8, 32], strides = [1, 1]} : vector<8x96xf32> to vector<8x32xf32>
    %132 = vector.extract_strided_slice %129 {offsets = [0, 64], sizes = [8, 32], strides = [1, 1]} : vector<8x96xf32> to vector<8x32xf32>
    %133 = vector.extract_strided_slice %123 {offsets = [0, 96], sizes = [8, 32], strides = [1, 1]} : vector<8x128xf32> to vector<8x32xf32>
    %134 = math.tanh %133 : vector<8x32xf32>
    %135 = arith.mulf %131, %114 : vector<8x32xf32>
    %136 = arith.mulf %130, %134 : vector<8x32xf32>
    %137 = arith.addf %135, %136 : vector<8x32xf32>
    %138 = math.tanh %137 : vector<8x32xf32>
    %139 = arith.mulf %132, %138 : vector<8x32xf32>
    %c5_i32 = arith.constant 5 : i32
    %c8_i32_41 = arith.constant 8 : i32
    %140 = arith.muli %c5_i32, %c8_i32_41 : i32
    %141 = tpu.assume_multiple %140, 8 : i32
    %142 = arith.index_cast %141 : i32 to index
    %c0_42 = arith.constant 0 : index
    %143 = vector.load %arg6[%142, %c0_42] : memref<72x128xf32, #tpu.memory_space<vmem>>, vector<8x128xf32>
    %c0_43 = arith.constant 0 : index
    %c0_44 = arith.constant 0 : index
    %144 = vector.load %arg3[%c0_43, %c0_44] : memref<32x128xf32, #tpu.memory_space<vmem>>, vector<32x128xf32>
    %cst_45 = arith.constant dense<0.000000e+00> : vector<8x128xf32>
    %145 = tpu.matmul %139, %144, %cst_45 {dimension_numbers = #tpu.dot_dimension_numbers<[1], [0], [0], [1], [0, 0, 1, 1], [], []>} : vector<8x32xf32>, vector<32x128xf32>, vector<8x128xf32> -> vector<8x128xf32>
    %146 = arith.addf %143, %145 : vector<8x128xf32>
    %147 = vector.extract_strided_slice %146 {offsets = [0, 0], sizes = [8, 96], strides = [1, 1]} : vector<8x128xf32> to vector<8x96xf32>
    %148 = arith.negf %147 : vector<8x96xf32>
    %149 = math.exp %148 : vector<8x96xf32>
    %cst_46 = arith.constant 1.000000e+00 : f32
    %150 = vector.broadcast %cst_46 : f32 to vector<8x96xf32>
    %151 = arith.addf %150, %149 : vector<8x96xf32>
    %152 = arith.divf %150, %151 : vector<8x96xf32>
    %153 = vector.extract_strided_slice %152 {offsets = [0, 0], sizes = [8, 32], strides = [1, 1]} : vector<8x96xf32> to vector<8x32xf32>
    %154 = vector.extract_strided_slice %152 {offsets = [0, 32], sizes = [8, 32], strides = [1, 1]} : vector<8x96xf32> to vector<8x32xf32>
    %155 = vector.extract_strided_slice %152 {offsets = [0, 64], sizes = [8, 32], strides = [1, 1]} : vector<8x96xf32> to vector<8x32xf32>
    %156 = vector.extract_strided_slice %146 {offsets = [0, 96], sizes = [8, 32], strides = [1, 1]} : vector<8x128xf32> to vector<8x32xf32>
    %157 = math.tanh %156 : vector<8x32xf32>
    %158 = arith.mulf %154, %137 : vector<8x32xf32>
    %159 = arith.mulf %153, %157 : vector<8x32xf32>
    %160 = arith.addf %158, %159 : vector<8x32xf32>
    %161 = math.tanh %160 : vector<8x32xf32>
    %162 = arith.mulf %155, %161 : vector<8x32xf32>
    %c6_i32 = arith.constant 6 : i32
    %c8_i32_47 = arith.constant 8 : i32
    %163 = arith.muli %c6_i32, %c8_i32_47 : i32
    %164 = tpu.assume_multiple %163, 8 : i32
    %165 = arith.index_cast %164 : i32 to index
    %c0_48 = arith.constant 0 : index
    %166 = vector.load %arg6[%165, %c0_48] : memref<72x128xf32, #tpu.memory_space<vmem>>, vector<8x128xf32>
    %c0_49 = arith.constant 0 : index
    %c0_50 = arith.constant 0 : index
    %167 = vector.load %arg3[%c0_49, %c0_50] : memref<32x128xf32, #tpu.memory_space<vmem>>, vector<32x128xf32>
    %cst_51 = arith.constant dense<0.000000e+00> : vector<8x128xf32>
    %168 = tpu.matmul %162, %167, %cst_51 {dimension_numbers = #tpu.dot_dimension_numbers<[1], [0], [0], [1], [0, 0, 1, 1], [], []>} : vector<8x32xf32>, vector<32x128xf32>, vector<8x128xf32> -> vector<8x128xf32>
    %169 = arith.addf %166, %168 : vector<8x128xf32>
    %170 = vector.extract_strided_slice %169 {offsets = [0, 0], sizes = [8, 96], strides = [1, 1]} : vector<8x128xf32> to vector<8x96xf32>
    %171 = arith.negf %170 : vector<8x96xf32>
    %172 = math.exp %171 : vector<8x96xf32>
    %cst_52 = arith.constant 1.000000e+00 : f32
    %173 = vector.broadcast %cst_52 : f32 to vector<8x96xf32>
    %174 = arith.addf %173, %172 : vector<8x96xf32>
    %175 = arith.divf %173, %174 : vector<8x96xf32>
    %176 = vector.extract_strided_slice %175 {offsets = [0, 0], sizes = [8, 32], strides = [1, 1]} : vector<8x96xf32> to vector<8x32xf32>
    %177 = vector.extract_strided_slice %175 {offsets = [0, 32], sizes = [8, 32], strides = [1, 1]} : vector<8x96xf32> to vector<8x32xf32>
    %178 = vector.extract_strided_slice %175 {offsets = [0, 64], sizes = [8, 32], strides = [1, 1]} : vector<8x96xf32> to vector<8x32xf32>
    %179 = vector.extract_strided_slice %169 {offsets = [0, 96], sizes = [8, 32], strides = [1, 1]} : vector<8x128xf32> to vector<8x32xf32>
    %180 = math.tanh %179 : vector<8x32xf32>
    %181 = arith.mulf %177, %160 : vector<8x32xf32>
    %182 = arith.mulf %176, %180 : vector<8x32xf32>
    %183 = arith.addf %181, %182 : vector<8x32xf32>
    %184 = math.tanh %183 : vector<8x32xf32>
    %185 = arith.mulf %178, %184 : vector<8x32xf32>
    %c7_i32 = arith.constant 7 : i32
    %c8_i32_53 = arith.constant 8 : i32
    %186 = arith.muli %c7_i32, %c8_i32_53 : i32
    %187 = tpu.assume_multiple %186, 8 : i32
    %188 = arith.index_cast %187 : i32 to index
    %c0_54 = arith.constant 0 : index
    %189 = vector.load %arg6[%188, %c0_54] : memref<72x128xf32, #tpu.memory_space<vmem>>, vector<8x128xf32>
    %c0_55 = arith.constant 0 : index
    %c0_56 = arith.constant 0 : index
    %190 = vector.load %arg3[%c0_55, %c0_56] : memref<32x128xf32, #tpu.memory_space<vmem>>, vector<32x128xf32>
    %cst_57 = arith.constant dense<0.000000e+00> : vector<8x128xf32>
    %191 = tpu.matmul %185, %190, %cst_57 {dimension_numbers = #tpu.dot_dimension_numbers<[1], [0], [0], [1], [0, 0, 1, 1], [], []>} : vector<8x32xf32>, vector<32x128xf32>, vector<8x128xf32> -> vector<8x128xf32>
    %192 = arith.addf %189, %191 : vector<8x128xf32>
    %193 = vector.extract_strided_slice %192 {offsets = [0, 0], sizes = [8, 96], strides = [1, 1]} : vector<8x128xf32> to vector<8x96xf32>
    %194 = arith.negf %193 : vector<8x96xf32>
    %195 = math.exp %194 : vector<8x96xf32>
    %cst_58 = arith.constant 1.000000e+00 : f32
    %196 = vector.broadcast %cst_58 : f32 to vector<8x96xf32>
    %197 = arith.addf %196, %195 : vector<8x96xf32>
    %198 = arith.divf %196, %197 : vector<8x96xf32>
    %199 = vector.extract_strided_slice %198 {offsets = [0, 0], sizes = [8, 32], strides = [1, 1]} : vector<8x96xf32> to vector<8x32xf32>
    %200 = vector.extract_strided_slice %198 {offsets = [0, 32], sizes = [8, 32], strides = [1, 1]} : vector<8x96xf32> to vector<8x32xf32>
    %201 = vector.extract_strided_slice %198 {offsets = [0, 64], sizes = [8, 32], strides = [1, 1]} : vector<8x96xf32> to vector<8x32xf32>
    %202 = vector.extract_strided_slice %192 {offsets = [0, 96], sizes = [8, 32], strides = [1, 1]} : vector<8x128xf32> to vector<8x32xf32>
    %203 = math.tanh %202 : vector<8x32xf32>
    %204 = arith.mulf %200, %183 : vector<8x32xf32>
    %205 = arith.mulf %199, %203 : vector<8x32xf32>
    %206 = arith.addf %204, %205 : vector<8x32xf32>
    %207 = math.tanh %206 : vector<8x32xf32>
    %208 = arith.mulf %201, %207 : vector<8x32xf32>
    %c8_i32_59 = arith.constant 8 : i32
    %c8_i32_60 = arith.constant 8 : i32
    %209 = arith.muli %c8_i32_59, %c8_i32_60 : i32
    %210 = tpu.assume_multiple %209, 8 : i32
    %211 = arith.index_cast %210 : i32 to index
    %c0_61 = arith.constant 0 : index
    %212 = vector.load %arg6[%211, %c0_61] : memref<72x128xf32, #tpu.memory_space<vmem>>, vector<8x128xf32>
    %c0_62 = arith.constant 0 : index
    %c0_63 = arith.constant 0 : index
    %213 = vector.load %arg3[%c0_62, %c0_63] : memref<32x128xf32, #tpu.memory_space<vmem>>, vector<32x128xf32>
    %cst_64 = arith.constant dense<0.000000e+00> : vector<8x128xf32>
    %214 = tpu.matmul %208, %213, %cst_64 {dimension_numbers = #tpu.dot_dimension_numbers<[1], [0], [0], [1], [0, 0, 1, 1], [], []>} : vector<8x32xf32>, vector<32x128xf32>, vector<8x128xf32> -> vector<8x128xf32>
    %215 = arith.addf %212, %214 : vector<8x128xf32>
    %216 = vector.extract_strided_slice %215 {offsets = [0, 0], sizes = [8, 96], strides = [1, 1]} : vector<8x128xf32> to vector<8x96xf32>
    %217 = arith.negf %216 : vector<8x96xf32>
    %218 = math.exp %217 : vector<8x96xf32>
    %cst_65 = arith.constant 1.000000e+00 : f32
    %219 = vector.broadcast %cst_65 : f32 to vector<8x96xf32>
    %220 = arith.addf %219, %218 : vector<8x96xf32>
    %221 = arith.divf %219, %220 : vector<8x96xf32>
    %222 = vector.extract_strided_slice %221 {offsets = [0, 0], sizes = [8, 32], strides = [1, 1]} : vector<8x96xf32> to vector<8x32xf32>
    %223 = vector.extract_strided_slice %221 {offsets = [0, 32], sizes = [8, 32], strides = [1, 1]} : vector<8x96xf32> to vector<8x32xf32>
    %224 = vector.extract_strided_slice %221 {offsets = [0, 64], sizes = [8, 32], strides = [1, 1]} : vector<8x96xf32> to vector<8x32xf32>
    %225 = vector.extract_strided_slice %215 {offsets = [0, 96], sizes = [8, 32], strides = [1, 1]} : vector<8x128xf32> to vector<8x32xf32>
    %226 = math.tanh %225 : vector<8x32xf32>
    %227 = arith.mulf %223, %206 : vector<8x32xf32>
    %228 = arith.mulf %222, %226 : vector<8x32xf32>
    %229 = arith.addf %227, %228 : vector<8x32xf32>
    %230 = math.tanh %229 : vector<8x32xf32>
    %231 = arith.mulf %224, %230 : vector<8x32xf32>
    %c9_i32 = arith.constant 9 : i32
    %c0_66 = arith.constant 0 : index
    %c0_67 = arith.constant 0 : index
    %232 = vector.load %arg5[%c0_66, %c0_67] : memref<8x32xf32, #tpu.memory_space<vmem>>, vector<8x32xf32>
    tpu.vector_store %arg5[%c0_66, %c0_67], %231 {strides = array<i32>} : memref<8x32xf32, #tpu.memory_space<vmem>>, vector<8x32xf32>,
    return
  }
  func.func @transform_0(%arg0: i32) -> (i32, i32) {
    %c0_i32 = arith.constant 0 : i32
    %c0_i32_0 = arith.constant 0 : i32
    %c0_i32_1 = arith.constant 0 : i32
    return %c0_i32, %c0_i32_0 : i32, i32
  }
  func.func @transform_1(%arg0: i32) -> (i32, i32) {
    %c0_i32 = arith.constant 0 : i32
    %c0_i32_0 = arith.constant 0 : i32
    %c0_i32_1 = arith.constant 0 : i32
    return %c0_i32, %c0_i32_0 : i32, i32
  }
  func.func @transform_2(%arg0: i32) -> (i32, i32) {
    %c0_i32 = arith.constant 0 : i32
    %c0_i32_0 = arith.constant 0 : i32
    %c0_i32_1 = arith.constant 0 : i32
    return %c0_i32, %c0_i32_0 : i32, i32
  }
  func.func @transform_3(%arg0: i32) -> (i32, i32) {
    %c0_i32 = arith.constant 0 : i32
    %c0_i32_0 = arith.constant 0 : i32
    %c0_i32_1 = arith.constant 0 : i32
    return %c0_i32, %c0_i32_0 : i32, i32
  }
  func.func @transform_4(%arg0: i32) -> (i32, i32) {
    %c0_i32 = arith.constant 0 : i32
    %c0_i32_0 = arith.constant 0 : i32
    %c0_i32_1 = arith.constant 0 : i32
    return %c0_i32, %c0_i32_0 : i32, i32
  }
}

</mosaic_0001>

<bundles_post_ra>
// kernel: tpu_custom_call.1
= control target key start
LH: loop header
LB: loop body
LE: loop exit
PB: predicated region body
PF: predicated region fallthrough
CT: control target
= control target key end

     0   :  { %s1147_s0 = inlined_call_operand.vmem [shape: f32[80,32], index: 0, kind: input, shape index: {}]   ;;  %s1148_s1 = inlined_call_operand.vmem [shape: f32[32,128], index: 1, kind: input, shape index: {}]   ;;  %s1149_s2 = inlined_call_operand.vmem [shape: f32[32,128], index: 2, kind: input, shape index: {}]   ;;  %s1150_s3 = inlined_call_operand.vmem [shape: f32[1,128], index: 3, kind: input, shape index: {}]   ;;  %s1151_s4 = inlined_call_operand.hbm [shape: f32[8,32], index: 4, kind: output, shape index: {}]  }
   0x1   :  { %v23_v0 = vld [vmem:[%s1148_s1 + $0x18] sm:$0xff]  ;;  %v22_v1 = vld [vmem:[%s1148_s1 + $0x10] sm:$0xff]  ;;  %v21_v2 = vld [vmem:[%s1148_s1 + $0x8] sm:$0xff] }
   0x2   :  { %43 = vmatpush.msra.mxu0 %v23_v0  ;;  %813 = vmatpush.msra.mxu2 %v23_v0 }
   0x3   :  { %99 = vmatpush.msra.mxu1 %v23_v0  ;;  %814 = vmatpush.msra.mxu3 %v23_v0 }
   0x4   :  { %9 = vsyncpa [#allocation4], 0  ;;  %44 = vmatpush.msra.mxu0 %v22_v1  ;;  %815 = vmatpush.msra.mxu2 %v22_v1  ;;  %v20_v3 = vld [vmem:[%s1148_s1] sm:$0xff]  ;;  %vm27_vm0 = vcmask 261120   ;;  %s931_s1 = smov 32   ;;  %v56_v25 = vld [vmem:[%s1147_s0 + $0x30] sm:$0xff] }
   0x5   :  { %100 = vmatpush.msra.mxu1 %v22_v1  ;;  %816 = vmatpush.msra.mxu3 %v22_v1  ;;  %v19_v4 = vld [vmem:[%s1147_s0] sm:$0xff]  ;;  %v990_v26 = vld [vmem:[%s1149_s2 + $0x18] sm:$0xff]  ;;  %v996_v27 = vld [vmem:[%s1149_s2 + $0x10] sm:$0xff]  ;;  %s775_s29 = sshll.u32 %s1151_s4, 4  ;;  %s776_s29 = int_to_ptr.hbm [resolvable:$true] %s775_s29 }
   0x6   :  { %45 = vmatpush.msra.mxu0 %v21_v2  ;;  %817 = vmatpush.msra.mxu2 %v21_v2  ;;  %v978_v5 = vld [vmem:[%s1150_s3] ss:$0 sm:$0xff]  ;;  %s932_s3 = smov 64   ;;  %v1004_v28 = vld [vmem:[%s1149_s2 + $0x8] sm:$0xff]  ;;  %v57_v30 = vld [vmem:[%s1147_s0 + $0x38] sm:$0xff] }
   0x7   :  { %101 = vmatpush.msra.mxu1 %v21_v2  ;;  %818 = vmatpush.msra.mxu3 %v21_v2  ;;  %v1012_v29 = vld [vmem:[%s1149_s2] sm:$0xff]  ;;  %v51_v33 = vld [vmem:[%s1147_s0 + $0x8] sm:$0xff]  ;;  %v52_v2 = vld [vmem:[%s1147_s0 + $0x10] sm:$0xff] }
   0x8   :  { %46 = vmatpush.msra.mxu0 %v20_v3  ;;  %819 = vmatpush.msra.mxu2 %v20_v3  ;;  %v58_v62 = vld [vmem:[%s1147_s0 + $0x40] sm:$0xff]  ;;  %v59_v63 = vld [vmem:[%s1147_s0 + $0x48] sm:$0xff] }
   0x9   :  { %784 = vmatmul.msk.f32.vlgmr.msra.gmra.mxu0 %vm27_vm0, %v19_v4  ;;  %102 = vmatpush.msra.mxu1 %v20_v3 }
   0xa   :  { %820 = vmatpush.msra.mxu3 %v20_v3  ;;  %790 = vmatmul.msk.f32.vlgmr.msra.gmra.mxu2 %vm27_vm0, %v56_v25 }
   0xb   :  { %193 = vmatpush.msrb.mxu2 %v990_v26  ;;  %327 = vmatpush.msrb.mxu0 %v990_v26 }
   0xc   :  { %262 = vmatpush.msrb.mxu3 %v990_v26  ;;  %785 = vmatmul.msk.f32.vlgmr.msra.gmra.mxu1 %vm27_vm0, %v51_v33 }
   0xd   :  { %194 = vmatpush.msrb.mxu2 %v996_v27  ;;  %328 = vmatpush.msrb.mxu0 %v996_v27 }
   0xe   :  { %263 = vmatpush.msrb.mxu3 %v996_v27 }
   0xf   :  { %195 = vmatpush.msrb.mxu2 %v1004_v28  ;;  %329 = vmatpush.msrb.mxu0 %v1004_v28 }
  0x10   :  { %264 = vmatpush.msrb.mxu3 %v1004_v28 }
  0x11   :  { %196 = vmatpush.msrb.mxu2 %v1012_v29  ;;  %330 = vmatpush.msrb.mxu0 %v1012_v29 }
  0x12   :  { %265 = vmatpush.msrb.mxu3 %v1012_v29  ;;  %791 = vmatmul.msk.f32.gmra.mxu2 %vm27_vm0, %v57_v30 }
  0x13   :  { %522 = vmatpush.msra.mxu0 %v990_v26  ;;  %392 = vmatpush.msra.mxu2 %v990_v26 }
  0x14   :  { %792 = vmatmul.msk.f32.vlgmr.msra.gmra.mxu3 %vm27_vm0, %v58_v62  ;;  %786 = vmatmul.msk.f32.gmra.mxu1 %vm27_vm0, %v52_v2 }
  0x15   :  { %523 = vmatpush.msra.mxu0 %v996_v27  ;;  %393 = vmatpush.msra.mxu2 %v996_v27 }
  0x16   :  { %457 = vmatpush.msra.mxu3 %v990_v26 }
  0x17   :  { %524 = vmatpush.msra.mxu0 %v1004_v28  ;;  %394 = vmatpush.msra.mxu2 %v1004_v28 }
  0x18   :  { %458 = vmatpush.msra.mxu3 %v996_v27 }
  0x19   :  { %525 = vmatpush.msra.mxu0 %v1012_v29  ;;  %395 = vmatpush.msra.mxu2 %v1012_v29 }
  0x1a   :  { %459 = vmatpush.msra.mxu3 %v1004_v28 }
  0x1c   :  { %460 = vmatpush.msra.mxu3 %v1012_v29 }
  0x1d   :  { %793 = vmatmul.msk.f32.gmra.mxu3 %vm27_vm0, %v59_v63  ;;  %v54_v63 = vld [vmem:[%s1147_s0 + $0x20] sm:$0xff] }
  0x86   :  { %v48_v6 = vpop.f32.mrf.mxu0 }
  0x87   :  { %v49_v7 = vadd.f32 %v978_v5, %v48_v6 }
  0x89   :  { %825 = vtanh.f32 %v49_v7  ;;  %v794_v9 = vmul.f32 -1.442695, %v49_v7  ;;  %v104_v37 = vpop.f32.mrf.mxu1 }
  0x8a   :  { %v105_v38 = vadd.f32 %v978_v5, %v104_v37  ;;  %v53_v37 = vld [vmem:[%s1147_s0 + $0x18] sm:$0xff] }
  0x8b   :  { %827 = vpow2.f32 %v794_v9  ;;  %787 = vmatmul.msk.f32.gmra.mxu1 %vm27_vm0, %v53_v37 }
  0x8d   :  { %v1042_v35 = vpop.f32.mrf.mxu2 }
  0x8f   :  { %v826_v8 = vpop.eup %825 }
  0x90   :  { %161 = vrot.lane.b32.xlu0 %v826_v8, %s931_s1 }
  0x91   :  { %v828_v10 = vpop.eup %827  ;;  %v107_v7 = vpop.f32.mrf.mxu1 }
  0x92   :  { %v143_v11 = vadd.f32 1.0, %v828_v10  ;;  %v108_v8 = vadd.f32 %v978_v5, %v107_v7 }
  0x93   :  { %788 = vmatmul.msk.f32.gmra.mxu1 %vm27_vm0, %v54_v63 }
  0x94   :  { %829 = vrcp.f32 %v143_v11  ;;  %v155_v17 = vand.u32 2147483648, %v143_v11  ;;  %vm149_vm2 = vweird.f32 %v143_v11  ;;  %v153_v18 = vand.u32 2147483647, %v143_v11 }
  0x95   :  { %v1044_v36 = vpop.f32.mrf.mxu2 }
  0x96   :  { %v156_v20 = vor.u32 1.1754944e-38, %v155_v17  ;;  %vm154_vm4 = vcmp.eq.f32.partialorder %v153_v18, 8.507059e+37 }
  0x97   :  { %v1072_v4 = vpop.f32.mrf.mxu3 }
  0x9a   :  { %v830_v12 = vpop.eup %829 }
  0x9b   :  { %v145_v13 = vmul.f32 %v830_v12, %v143_v11  ;;  %vm150_vm1 = vweird.f32 %v830_v12 }
  0x9c   :  { %vm151_vm3 = vmor %vm149_vm2, %vm150_vm1 }
  0x9d   :  { %v146_v14 = vsub.f32 1.0, %v145_v13 }
  0x9f   :  { %v147_v15 = vmul.f32 %v830_v12, %v146_v14 }
  0xa0   :  { %v1074_v6 = vpop.f32.mrf.mxu3 }
  0xa1   :  { %v148_v16 = vadd.f32 %v830_v12, %v147_v15 }
  0xa3   :  { %v152_v19 = vsel %vm151_vm3, %v830_v12, %v148_v16 }
  0xa4   :  { %v157_v22 = vsel %vm154_vm4, %v156_v20, %v152_v19 }
 0x102   :  { %v162_v21 = vpop.permute.xlu0 %161 }
 0x103   :  { %v164_v23 = vmul.f32 %v162_v21, %v157_v22 }
 0x105   :  { %831 = vtanh.f32 %v164_v23  ;;  %223 = vrot.lane.b32.xlu2 %v164_v23, %s931_s1 }
 0x10b   :  { %v832_v24 = vpop.eup %831 }
 0x10c   :  { %167 = vrot.lane.b32.xlu0 %v832_v24, %s932_s3 }
 0x15f   :  { %v224_v57 = vpop.permute.xlu2 %223 }
 0x17e   :  { %v168_v31 = vpop.permute.xlu0 %167 }
 0x17f   :  { %v170_v32 = vmul.f32 %v168_v31, %v157_v22 }
 0x181   :  { %177 = vrot.lane.b32.xlu1 %v170_v32, %s932_s3 }
 0x1f3   :  { %v178_v34 = vpop.permute.xlu1 %177 }
 0x1f4   :  { %795 = vmatmul.msk.f32.vlgmr.msrb.gmra.mxu2 %vm27_vm0, %v178_v34 }
 0x1f5   :  { %587 = vmatpush.msrb.mxu2 %v990_v26 }
 0x1f7   :  { %588 = vmatpush.msrb.mxu2 %v996_v27 }
 0x1f9   :  { %589 = vmatpush.msrb.mxu2 %v1004_v28 }
 0x1fb   :  { %590 = vmatpush.msrb.mxu2 %v1012_v29 }
 0x277   :  { %v198_v39 = vpop.f32.mrf.mxu2 }
 0x278   :  { %v201_v40 = vadd.f32 %v198_v39, %v105_v38 }
 0x27a   :  { %833 = vtanh.f32 %v201_v40  ;;  %v796_v42 = vmul.f32 -1.442695, %v201_v40 }
 0x27c   :  { %835 = vpow2.f32 %v796_v42 }
 0x280   :  { %v834_v41 = vpop.eup %833 }
 0x281   :  { %228 = vrot.lane.b32.xlu1 %v834_v41, %s931_s1  ;;  %v110_v41 = vpop.f32.mrf.mxu1 }
 0x282   :  { %v836_v43 = vpop.eup %835  ;;  %v111_v42 = vadd.f32 %v978_v5, %v110_v41 }
 0x283   :  { %v205_v44 = vadd.f32 1.0, %v836_v43 }
 0x285   :  { %837 = vrcp.f32 %v205_v44  ;;  %v217_v50 = vand.u32 2147483648, %v205_v44  ;;  %vm211_vm6 = vweird.f32 %v205_v44  ;;  %v215_v51 = vand.u32 2147483647, %v205_v44 }
 0x287   :  { %v218_v53 = vor.u32 1.1754944e-38, %v217_v50  ;;  %vm216_vm8 = vcmp.eq.f32.partialorder %v215_v51, 8.507059e+37 }
 0x28b   :  { %v838_v45 = vpop.eup %837 }
 0x28c   :  { %v207_v46 = vmul.f32 %v838_v45, %v205_v44  ;;  %vm212_vm5 = vweird.f32 %v838_v45 }
 0x28d   :  { %vm213_vm7 = vmor %vm211_vm6, %vm212_vm5 }
 0x28e   :  { %v208_v47 = vsub.f32 1.0, %v207_v46 }
 0x290   :  { %v209_v48 = vmul.f32 %v838_v45, %v208_v47 }
 0x292   :  { %v210_v49 = vadd.f32 %v838_v45, %v209_v48 }
 0x294   :  { %v214_v52 = vsel %vm213_vm7, %v838_v45, %v210_v49 }
 0x295   :  { %v219_v55 = vsel %vm216_vm8, %v218_v53, %v214_v52 }
 0x296   :  { %v226_v58 = vmul.f32 %v224_v57, %v219_v55 }
 0x2f3   :  { %v229_v54 = vpop.permute.xlu1 %228 }
 0x2f4   :  { %v231_v56 = vmul.f32 %v229_v54, %v219_v55 }
 0x2f6   :  { %233 = vrot.lane.b32.xlu2 %v231_v56, %s931_s1 }
 0x350   :  { %v234_v59 = vpop.permute.xlu2 %233 }
 0x351   :  { %v236_v60 = vadd.f32 %v234_v59, %v226_v58 }
 0x353   :  { %839 = vtanh.f32 %v236_v60 }
 0x359   :  { %v840_v61 = vpop.eup %839 }
 0x35a   :  { %239 = vrot.lane.b32.xlu0 %v840_v61, %s931_s1 }
 0x3cc   :  { %v240_v0 = vpop.permute.xlu0 %239 }
 0x3cd   :  { %v242_v1 = vmul.f32 %v240_v0, %v219_v55 }
 0x3cf   :  { %246 = vrot.lane.b32.xlu1 %v242_v1, %s932_s3  ;;  %v113_v1 = vpop.f32.mrf.mxu1 }
 0x3d0   :  { %v114_v2 = vadd.f32 %v978_v5, %v113_v1 }
 0x441   :  { %v247_v3 = vpop.permute.xlu1 %246 }
 0x442   :  { %797 = vmatmul.msk.f32.vlgmr.msrb.gmra.mxu3 %vm27_vm0, %v247_v3 }
 0x443   :  { %652 = vmatpush.msrb.mxu3 %v990_v26 }
 0x445   :  { %653 = vmatpush.msrb.mxu3 %v996_v27 }
 0x447   :  { %654 = vmatpush.msrb.mxu3 %v1004_v28 }
 0x449   :  { %655 = vmatpush.msrb.mxu3 %v1012_v29 }
 0x4c5   :  { %v267_v9 = vpop.f32.mrf.mxu3 }
 0x4c6   :  { %v270_v10 = vadd.f32 %v267_v9, %v108_v8 }
 0x4c8   :  { %841 = vtanh.f32 %v270_v10  ;;  %v798_v12 = vmul.f32 -1.442695, %v270_v10 }
 0x4ca   :  { %843 = vpow2.f32 %v798_v12 }
 0x4ce   :  { %v842_v11 = vpop.eup %841 }
 0x4cf   :  { %293 = vrot.lane.b32.xlu2 %v842_v11, %s931_s1 }
 0x4d0   :  { %v844_v13 = vpop.eup %843 }
 0x4d1   :  { %v274_v14 = vadd.f32 1.0, %v844_v13 }
 0x4d3   :  { %845 = vrcp.f32 %v274_v14  ;;  %v286_v20 = vand.u32 2147483648, %v274_v14  ;;  %vm280_vm10 = vweird.f32 %v274_v14  ;;  %v284_v21 = vand.u32 2147483647, %v274_v14 }
 0x4d5   :  { %v287_v23 = vor.u32 1.1754944e-38, %v286_v20  ;;  %vm285_vm12 = vcmp.eq.f32.partialorder %v284_v21, 8.507059e+37 }
 0x4d9   :  { %v846_v15 = vpop.eup %845 }
 0x4da   :  { %v276_v16 = vmul.f32 %v846_v15, %v274_v14  ;;  %vm281_vm9 = vweird.f32 %v846_v15 }
 0x4db   :  { %vm282_vm11 = vmor %vm280_vm10, %vm281_vm9 }
 0x4dc   :  { %v277_v17 = vsub.f32 1.0, %v276_v16 }
 0x4de   :  { %v278_v18 = vmul.f32 %v846_v15, %v277_v17 }
 0x4e0   :  { %v279_v19 = vadd.f32 %v846_v15, %v278_v18 }
 0x4e2   :  { %v283_v22 = vsel %vm282_vm11, %v846_v15, %v279_v19 }
 0x4e3   :  { %v288_v25 = vsel %vm285_vm12, %v287_v23, %v283_v22 }
 0x4e4   :  { %v291_v31 = vmul.f32 %v288_v25, %v236_v60 }
 0x529   :  { %v294_v24 = vpop.permute.xlu2 %293 }
 0x52a   :  { %v296_v30 = vmul.f32 %v294_v24, %v288_v25 }
 0x52c   :  { %298 = vrot.lane.b32.xlu0 %v296_v30, %s931_s1 }
 0x59e   :  { %v299_v32 = vpop.permute.xlu0 %298 }
 0x59f   :  { %v301_v33 = vadd.f32 %v299_v32, %v291_v31 }
 0x5a1   :  { %847 = vtanh.f32 %v301_v33 }
 0x5a7   :  { %v848_v34 = vpop.eup %847 }
 0x5a8   :  { %304 = vrot.lane.b32.xlu1 %v848_v34, %s931_s1  ;;  %v55_v34 = vld [vmem:[%s1147_s0 + $0x28] sm:$0xff]  ;;  %s933_s0 = smov [#allocation3]  }
 0x5a9   :  { %789 = vmatmul.msk.f32.gmra.mxu1 %vm27_vm0, %v55_v34  ;;  %s773_s26 = sshll.u32 %s933_s0, 4  ;;  %s774_s26 = int_to_ptr.vmem [resolvable:$true] %s773_s26 }
 0x61a   :  { %v305_v38 = vpop.permute.xlu1 %304 }
 0x61b   :  { %v307_v39 = vmul.f32 %v305_v38, %v288_v25 }
 0x61d   :  { %311 = vrot.lane.b32.xlu2 %v307_v39, %s932_s3 }
 0x626   :  { %v116_v38 = vpop.f32.mrf.mxu1 }
 0x627   :  { %v117_v39 = vadd.f32 %v978_v5, %v116_v38 }
 0x677   :  { %v312_v40 = vpop.permute.xlu2 %311 }
 0x678   :  { %799 = vmatmul.msk.f32.vlgmr.msrb.gmra.mxu0 %vm27_vm0, %v312_v40 }
 0x679   :  { %717 = vmatpush.msrb.mxu0 %v990_v26 }
 0x67b   :  { %718 = vmatpush.msrb.mxu0 %v996_v27 }
 0x67d   :  { %719 = vmatpush.msrb.mxu0 %v1004_v28 }
 0x67f   :  { %720 = vmatpush.msrb.mxu0 %v1012_v29 }
 0x6f5   :  { %v332_v43 = vpop.f32.mrf.mxu0 }
 0x6f6   :  { %v335_v44 = vadd.f32 %v332_v43, %v111_v42 }
 0x6f8   :  { %849 = vtanh.f32 %v335_v44  ;;  %v800_v46 = vmul.f32 -1.442695, %v335_v44 }
 0x6fa   :  { %851 = vpow2.f32 %v800_v46 }
 0x6fe   :  { %v850_v45 = vpop.eup %849 }
 0x6ff   :  { %358 = vrot.lane.b32.xlu0 %v850_v45, %s931_s1 }
 0x700   :  { %v852_v47 = vpop.eup %851 }
 0x701   :  { %v339_v48 = vadd.f32 1.0, %v852_v47 }
 0x703   :  { %853 = vrcp.f32 %v339_v48  ;;  %v351_v29 = vand.u32 2147483648, %v339_v48  ;;  %vm345_vm14 = vweird.f32 %v339_v48  ;;  %v349_v51 = vand.u32 2147483647, %v339_v48 }
 0x705   :  { %v352_v53 = vor.u32 1.1754944e-38, %v351_v29  ;;  %vm350_vm1 = vcmp.eq.f32.partialorder %v349_v51, 8.507059e+37 }
 0x709   :  { %v854_v26 = vpop.eup %853 }
 0x70a   :  { %v341_v27 = vmul.f32 %v854_v26, %v339_v48  ;;  %vm346_vm13 = vweird.f32 %v854_v26 }
 0x70b   :  { %vm347_vm15 = vmor %vm345_vm14, %vm346_vm13 }
 0x70c   :  { %v342_v49 = vsub.f32 1.0, %v341_v27 }
 0x70e   :  { %v343_v28 = vmul.f32 %v854_v26, %v342_v49 }
 0x710   :  { %v344_v50 = vadd.f32 %v854_v26, %v343_v28 }
 0x712   :  { %v348_v52 = vsel %vm347_vm15, %v854_v26, %v344_v50 }
 0x713   :  { %v353_v55 = vsel %vm350_vm1, %v352_v53, %v348_v52 }
 0x714   :  { %v356_v57 = vmul.f32 %v353_v55, %v301_v33 }
 0x771   :  { %v359_v54 = vpop.permute.xlu0 %358 }
 0x772   :  { %v361_v56 = vmul.f32 %v359_v54, %v353_v55 }
 0x774   :  { %363 = vrot.lane.b32.xlu1 %v361_v56, %s931_s1 }
 0x7e6   :  { %v364_v58 = vpop.permute.xlu1 %363 }
 0x7e7   :  { %v366_v59 = vadd.f32 %v364_v58, %v356_v57 }
 0x7e9   :  { %855 = vtanh.f32 %v366_v59 }
 0x7ef   :  { %v856_v60 = vpop.eup %855 }
 0x7f0   :  { %369 = vrot.lane.b32.xlu2 %v856_v60, %s931_s1 }
 0x84a   :  { %v370_v61 = vpop.permute.xlu2 %369 }
 0x84b   :  { %v372_v62 = vmul.f32 %v370_v61, %v353_v55  ;;  %v120_v61 = vadd.f32 %v978_v5, %v1042_v35 }
 0x84d   :  { %376 = vrot.lane.b32.xlu0 %v372_v62, %s932_s3 }
 0x8bf   :  { %v377_v0 = vpop.permute.xlu0 %376 }
 0x8c0   :  { %801 = vmatmul.msk.f32.vlgmr.msra.gmra.mxu2 %vm27_vm0, %v377_v0 }
 0x943   :  { %v397_v3 = vpop.f32.mrf.mxu2 }
 0x944   :  { %v400_v7 = vadd.f32 %v397_v3, %v114_v2 }
 0x946   :  { %857 = vtanh.f32 %v400_v7  ;;  %v802_v9 = vmul.f32 -1.442695, %v400_v7 }
 0x948   :  { %859 = vpow2.f32 %v802_v9 }
 0x94c   :  { %v858_v8 = vpop.eup %857 }
 0x94d   :  { %423 = vrot.lane.b32.xlu1 %v858_v8, %s931_s1 }
 0x94e   :  { %v860_v10 = vpop.eup %859 }
 0x94f   :  { %v404_v11 = vadd.f32 1.0, %v860_v10 }
 0x951   :  { %861 = vrcp.f32 %v404_v11  ;;  %v416_v17 = vand.u32 2147483648, %v404_v11  ;;  %vm410_vm3 = vweird.f32 %v404_v11  ;;  %v414_v18 = vand.u32 2147483647, %v404_v11 }
 0x953   :  { %v417_v20 = vor.u32 1.1754944e-38, %v416_v17  ;;  %vm415_vm5 = vcmp.eq.f32.partialorder %v414_v18, 8.507059e+37 }
 0x957   :  { %v862_v12 = vpop.eup %861 }
 0x958   :  { %v406_v13 = vmul.f32 %v862_v12, %v404_v11  ;;  %vm411_vm2 = vweird.f32 %v862_v12 }
 0x959   :  { %vm412_vm4 = vmor %vm410_vm3, %vm411_vm2 }
 0x95a   :  { %v407_v14 = vsub.f32 1.0, %v406_v13 }
 0x95c   :  { %v408_v15 = vmul.f32 %v862_v12, %v407_v14 }
 0x95e   :  { %v409_v16 = vadd.f32 %v862_v12, %v408_v15 }
 0x960   :  { %v413_v19 = vsel %vm412_vm4, %v862_v12, %v409_v16 }
 0x961   :  { %v418_v22 = vsel %vm415_vm5, %v417_v20, %v413_v19 }
 0x962   :  { %v421_v24 = vmul.f32 %v418_v22, %v366_v59 }
 0x9bf   :  { %v424_v21 = vpop.permute.xlu1 %423 }
 0x9c0   :  { %v426_v23 = vmul.f32 %v424_v21, %v418_v22 }
 0x9c2   :  { %428 = vrot.lane.b32.xlu2 %v426_v23, %s931_s1 }
 0xa1c   :  { %v429_v25 = vpop.permute.xlu2 %428 }
 0xa1d   :  { %v431_v30 = vadd.f32 %v429_v25, %v421_v24  ;;  %v123_v25 = vadd.f32 %v978_v5, %v1044_v36 }
 0xa1f   :  { %863 = vtanh.f32 %v431_v30 }
 0xa25   :  { %v864_v31 = vpop.eup %863 }
 0xa26   :  { %434 = vrot.lane.b32.xlu0 %v864_v31, %s931_s1 }
 0xa98   :  { %v435_v32 = vpop.permute.xlu0 %434 }
 0xa99   :  { %v437_v33 = vmul.f32 %v435_v32, %v418_v22 }
 0xa9b   :  { %441 = vrot.lane.b32.xlu1 %v437_v33, %s932_s3 }
 0xb0d   :  { %v442_v37 = vpop.permute.xlu1 %441 }
 0xb0e   :  { %803 = vmatmul.msk.f32.vlgmr.msra.gmra.mxu3 %vm27_vm0, %v442_v37 }
 0xb91   :  { %v462_v40 = vpop.f32.mrf.mxu3 }
 0xb92   :  { %v465_v41 = vadd.f32 %v462_v40, %v117_v39 }
 0xb94   :  { %865 = vtanh.f32 %v465_v41  ;;  %v804_v43 = vmul.f32 -1.442695, %v465_v41 }
 0xb96   :  { %867 = vpow2.f32 %v804_v43 }
 0xb9a   :  { %v866_v42 = vpop.eup %865 }
 0xb9b   :  { %488 = vrot.lane.b32.xlu2 %v866_v42, %s931_s1 }
 0xb9c   :  { %v868_v44 = vpop.eup %867 }
 0xb9d   :  { %v469_v45 = vadd.f32 1.0, %v868_v44 }
 0xb9f   :  { %869 = vrcp.f32 %v469_v45  ;;  %v481_v49 = vand.u32 2147483648, %v469_v45  ;;  %vm475_vm7 = vweird.f32 %v469_v45  ;;  %v479_v28 = vand.u32 2147483647, %v469_v45 }
 0xba1   :  { %v482_v29 = vor.u32 1.1754944e-38, %v481_v49  ;;  %vm480_vm9 = vcmp.eq.f32.partialorder %v479_v28, 8.507059e+37 }
 0xba5   :  { %v870_v46 = vpop.eup %869 }
 0xba6   :  { %v471_v47 = vmul.f32 %v870_v46, %v469_v45  ;;  %vm476_vm6 = vweird.f32 %v870_v46 }
 0xba7   :  { %vm477_vm8 = vmor %vm475_vm7, %vm476_vm6 }
 0xba8   :  { %v472_v48 = vsub.f32 1.0, %v471_v47 }
 0xbaa   :  { %v473_v26 = vmul.f32 %v870_v46, %v472_v48 }
 0xbac   :  { %v474_v27 = vadd.f32 %v870_v46, %v473_v26 }
 0xbae   :  { %v478_v50 = vsel %vm477_vm8, %v870_v46, %v474_v27 }
 0xbaf   :  { %v483_v52 = vsel %vm480_vm9, %v482_v29, %v478_v50 }
 0xbb0   :  { %v486_v54 = vmul.f32 %v483_v52, %v431_v30 }
 0xbf5   :  { %v489_v51 = vpop.permute.xlu2 %488 }
 0xbf6   :  { %v491_v53 = vmul.f32 %v489_v51, %v483_v52 }
 0xbf8   :  { %493 = vrot.lane.b32.xlu0 %v491_v53, %s931_s1 }
 0xc6a   :  { %v494_v55 = vpop.permute.xlu0 %493 }
 0xc6b   :  { %v496_v56 = vadd.f32 %v494_v55, %v486_v54 }
 0xc6d   :  { %871 = vtanh.f32 %v496_v56 }
 0xc73   :  { %v872_v57 = vpop.eup %871 }
 0xc74   :  { %499 = vrot.lane.b32.xlu1 %v872_v57, %s931_s1 }
 0xce6   :  { %v500_v58 = vpop.permute.xlu1 %499 }
 0xce7   :  { %v502_v59 = vmul.f32 %v500_v58, %v483_v52  ;;  %v126_v52 = vadd.f32 %v978_v5, %v1072_v4 }
 0xce9   :  { %506 = vrot.lane.b32.xlu2 %v502_v59, %s932_s3 }
 0xd43   :  { %v507_v60 = vpop.permute.xlu2 %506 }
 0xd44   :  { %805 = vmatmul.msk.f32.vlgmr.msra.gmra.mxu0 %vm27_vm0, %v507_v60 }
 0xdc1   :  { %v527_v62 = vpop.f32.mrf.mxu0 }
 0xdc2   :  { %v530_v63 = vadd.f32 %v527_v62, %v120_v61 }
 0xdc4   :  { %873 = vtanh.f32 %v530_v63  ;;  %v806_v1 = vmul.f32 -1.442695, %v530_v63 }
 0xdc6   :  { %875 = vpow2.f32 %v806_v1 }
 0xdca   :  { %v874_v0 = vpop.eup %873 }
 0xdcb   :  { %553 = vrot.lane.b32.xlu0 %v874_v0, %s931_s1 }
 0xdcc   :  { %v876_v2 = vpop.eup %875 }
 0xdcd   :  { %v534_v3 = vadd.f32 1.0, %v876_v2 }
 0xdcf   :  { %877 = vrcp.f32 %v534_v3  ;;  %v546_v12 = vand.u32 2147483648, %v534_v3  ;;  %vm540_vm11 = vweird.f32 %v534_v3  ;;  %v544_v35 = vand.u32 2147483647, %v534_v3 }
 0xdd1   :  { %v547_v14 = vor.u32 1.1754944e-38, %v546_v12  ;;  %vm545_vm13 = vcmp.eq.f32.partialorder %v544_v35, 8.507059e+37 }
 0xdd5   :  { %v878_v7 = vpop.eup %877 }
 0xdd6   :  { %v536_v8 = vmul.f32 %v878_v7, %v534_v3  ;;  %vm541_vm10 = vweird.f32 %v878_v7 }
 0xdd7   :  { %vm542_vm12 = vmor %vm540_vm11, %vm541_vm10 }
 0xdd8   :  { %v537_v9 = vsub.f32 1.0, %v536_v8 }
 0xdda   :  { %v538_v10 = vmul.f32 %v878_v7, %v537_v9 }
 0xddc   :  { %v539_v11 = vadd.f32 %v878_v7, %v538_v10 }
 0xdde   :  { %v543_v13 = vsel %vm542_vm12, %v878_v7, %v539_v11 }
 0xddf   :  { %v548_v16 = vsel %vm545_vm13, %v547_v14, %v543_v13 }
 0xde0   :  { %v551_v18 = vmul.f32 %v548_v16, %v496_v56 }
 0xe3d   :  { %v554_v15 = vpop.permute.xlu0 %553 }
 0xe3e   :  { %v556_v17 = vmul.f32 %v554_v15, %v548_v16  ;;  %v129_v15 = vadd.f32 %v978_v5, %v1074_v6 }
 0xe40   :  { %558 = vrot.lane.b32.xlu1 %v556_v17, %s931_s1 }
 0xeb2   :  { %v559_v19 = vpop.permute.xlu1 %558 }
 0xeb3   :  { %v561_v20 = vadd.f32 %v559_v19, %v551_v18 }
 0xeb5   :  { %879 = vtanh.f32 %v561_v20 }
 0xebb   :  { %v880_v21 = vpop.eup %879 }
 0xebc   :  { %564 = vrot.lane.b32.xlu2 %v880_v21, %s931_s1 }
 0xf16   :  { %v565_v22 = vpop.permute.xlu2 %564 }
 0xf17   :  { %v567_v23 = vmul.f32 %v565_v22, %v548_v16 }
 0xf19   :  { %571 = vrot.lane.b32.xlu0 %v567_v23, %s932_s3 }
 0xf8b   :  { %v572_v24 = vpop.permute.xlu0 %571 }
 0xf8c   :  { %807 = vmatmul.msk.f32.vlgmr.msrb.gmra.mxu2 %vm27_vm0, %v572_v24 }
0x100f   :  { %v592_v30 = vpop.f32.mrf.mxu2 }
0x1010   :  { %v595_v31 = vadd.f32 %v592_v30, %v123_v25 }
0x1012   :  { %881 = vtanh.f32 %v595_v31  ;;  %v808_v33 = vmul.f32 -1.442695, %v595_v31 }
0x1014   :  { %883 = vpow2.f32 %v808_v33 }
0x1018   :  { %v882_v32 = vpop.eup %881 }
0x1019   :  { %618 = vrot.lane.b32.xlu1 %v882_v32, %s931_s1 }
0x101a   :  { %v884_v34 = vpop.eup %883 }
0x101b   :  { %v599_v37 = vadd.f32 1.0, %v884_v34 }
0x101d   :  { %885 = vrcp.f32 %v599_v37  ;;  %v611_v43 = vand.u32 2147483648, %v599_v37  ;;  %vm605_vm15 = vweird.f32 %v599_v37  ;;  %v609_v36 = vand.u32 2147483647, %v599_v37 }
0x101f   :  { %v612_v45 = vor.u32 1.1754944e-38, %v611_v43  ;;  %vm610_vm2 = vcmp.eq.f32.partialorder %v609_v36, 8.507059e+37 }
0x1023   :  { %v886_v38 = vpop.eup %885 }
0x1024   :  { %v601_v39 = vmul.f32 %v886_v38, %v599_v37  ;;  %vm606_vm14 = vweird.f32 %v886_v38 }
0x1025   :  { %vm607_vm1 = vmor %vm605_vm15, %vm606_vm14 }
0x1026   :  { %v602_v40 = vsub.f32 1.0, %v601_v39 }
0x1028   :  { %v603_v41 = vmul.f32 %v886_v38, %v602_v40 }
0x102a   :  { %v604_v42 = vadd.f32 %v886_v38, %v603_v41 }
0x102c   :  { %v608_v44 = vsel %vm607_vm1, %v886_v38, %v604_v42 }
0x102d   :  { %v613_v47 = vsel %vm610_vm2, %v612_v45, %v608_v44 }
0x102e   :  { %v616_v26 = vmul.f32 %v613_v47, %v561_v20 }
0x108b   :  { %v619_v46 = vpop.permute.xlu1 %618 }
0x108c   :  { %v621_v48 = vmul.f32 %v619_v46, %v613_v47 }
0x108e   :  { %623 = vrot.lane.b32.xlu2 %v621_v48, %s931_s1 }
0x10e8   :  { %v624_v27 = vpop.permute.xlu2 %623 }
0x10e9   :  { %v626_v49 = vadd.f32 %v624_v27, %v616_v26 }
0x10eb   :  { %887 = vtanh.f32 %v626_v49 }
0x10f1   :  { %v888_v28 = vpop.eup %887 }
0x10f2   :  { %629 = vrot.lane.b32.xlu0 %v888_v28, %s931_s1 }
0x1164   :  { %v630_v50 = vpop.permute.xlu0 %629 }
0x1165   :  { %v632_v29 = vmul.f32 %v630_v50, %v613_v47 }
0x1167   :  { %636 = vrot.lane.b32.xlu1 %v632_v29, %s932_s3 }
0x11d9   :  { %v637_v51 = vpop.permute.xlu1 %636 }
0x11da   :  { %809 = vmatmul.msk.f32.vlgmr.msrb.gmra.mxu3 %vm27_vm0, %v637_v51 }
0x125d   :  { %v657_v53 = vpop.f32.mrf.mxu3 }
0x125e   :  { %v660_v54 = vadd.f32 %v657_v53, %v126_v52 }
0x1260   :  { %889 = vtanh.f32 %v660_v54  ;;  %v810_v56 = vmul.f32 -1.442695, %v660_v54 }
0x1262   :  { %891 = vpow2.f32 %v810_v56 }
0x1266   :  { %v890_v55 = vpop.eup %889 }
0x1267   :  { %683 = vrot.lane.b32.xlu2 %v890_v55, %s931_s1 }
0x1268   :  { %v892_v57 = vpop.eup %891 }
0x1269   :  { %v664_v58 = vadd.f32 1.0, %v892_v57 }
0x126b   :  { %893 = vrcp.f32 %v664_v58  ;;  %v676_v0 = vand.u32 2147483648, %v664_v58  ;;  %vm670_vm4 = vweird.f32 %v664_v58  ;;  %v674_v4 = vand.u32 2147483647, %v664_v58 }
0x126d   :  { %v677_v2 = vor.u32 1.1754944e-38, %v676_v0  ;;  %vm675_vm6 = vcmp.eq.f32.partialorder %v674_v4, 8.507059e+37 }
0x1271   :  { %v894_v59 = vpop.eup %893 }
0x1272   :  { %v666_v60 = vmul.f32 %v894_v59, %v664_v58  ;;  %vm671_vm3 = vweird.f32 %v894_v59 }
0x1273   :  { %vm672_vm5 = vmor %vm670_vm4, %vm671_vm3 }
0x1274   :  { %v667_v61 = vsub.f32 1.0, %v666_v60 }
0x1276   :  { %v668_v62 = vmul.f32 %v894_v59, %v667_v61 }
0x1278   :  { %v669_v63 = vadd.f32 %v894_v59, %v668_v62 }
0x127a   :  { %v673_v1 = vsel %vm672_vm5, %v894_v59, %v669_v63 }
0x127b   :  { %v678_v7 = vsel %vm675_vm6, %v677_v2, %v673_v1 }
0x127c   :  { %v681_v9 = vmul.f32 %v678_v7, %v626_v49 }
0x12c1   :  { %v684_v3 = vpop.permute.xlu2 %683 }
0x12c2   :  { %v686_v8 = vmul.f32 %v684_v3, %v678_v7 }
0x12c4   :  { %688 = vrot.lane.b32.xlu0 %v686_v8, %s931_s1 }
0x1336   :  { %v689_v10 = vpop.permute.xlu0 %688 }
0x1337   :  { %v691_v11 = vadd.f32 %v689_v10, %v681_v9 }
0x1339   :  { %895 = vtanh.f32 %v691_v11 }
0x133f   :  { %v896_v12 = vpop.eup %895 }
0x1340   :  { %694 = vrot.lane.b32.xlu1 %v896_v12, %s931_s1 }
0x13b2   :  { %v695_v35 = vpop.permute.xlu1 %694 }
0x13b3   :  { %v697_v13 = vmul.f32 %v695_v35, %v678_v7 }
0x13b5   :  { %701 = vrot.lane.b32.xlu2 %v697_v13, %s932_s3 }
0x140f   :  { %v702_v14 = vpop.permute.xlu2 %701 }
0x1410   :  { %811 = vmatmul.msk.f32.vlgmr.msrb.gmra.mxu0 %vm27_vm0, %v702_v14 }
0x148d   :  { %v722_v16 = vpop.f32.mrf.mxu0 }
0x148e   :  { %v725_v17 = vadd.f32 %v722_v16, %v129_v15 }
0x1490   :  { %897 = vtanh.f32 %v725_v17  ;;  %v812_v19 = vmul.f32 -1.442695, %v725_v17 }
0x1492   :  { %899 = vpow2.f32 %v812_v19 }
0x1496   :  { %v898_v18 = vpop.eup %897 }
0x1497   :  { %748 = vrot.lane.b32.xlu0 %v898_v18, %s931_s1 }
0x1498   :  { %v900_v20 = vpop.eup %899 }
0x1499   :  { %v729_v21 = vadd.f32 1.0, %v900_v20 }
0x149b   :  { %901 = vrcp.f32 %v729_v21  ;;  %v741_v31 = vand.u32 2147483648, %v729_v21  ;;  %vm735_vm8 = vweird.f32 %v729_v21  ;;  %v739_v5 = vand.u32 2147483647, %v729_v21 }
0x149d   :  { %v742_v32 = vor.u32 1.1754944e-38, %v741_v31  ;;  %vm740_vm10 = vcmp.eq.f32.partialorder %v739_v5, 8.507059e+37 }
0x14a1   :  { %v902_v22 = vpop.eup %901 }
0x14a2   :  { %v731_v23 = vmul.f32 %v902_v22, %v729_v21  ;;  %vm736_vm7 = vweird.f32 %v902_v22 }
0x14a3   :  { %vm737_vm9 = vmor %vm735_vm8, %vm736_vm7 }
0x14a4   :  { %v732_v24 = vsub.f32 1.0, %v731_v23 }
0x14a6   :  { %v733_v25 = vmul.f32 %v902_v22, %v732_v24 }
0x14a8   :  { %v734_v30 = vadd.f32 %v902_v22, %v733_v25 }
0x14aa   :  { %v738_v6 = vsel %vm737_vm9, %v902_v22, %v734_v30 }
0x14ab   :  { %v743_v34 = vsel %vm740_vm10, %v742_v32, %v738_v6 }
0x14ac   :  { %v746_v38 = vmul.f32 %v743_v34, %v691_v11 }
0x1509   :  { %v749_v33 = vpop.permute.xlu0 %748 }
0x150a   :  { %v751_v37 = vmul.f32 %v749_v33, %v743_v34 }
0x150c   :  { %753 = vrot.lane.b32.xlu1 %v751_v37, %s931_s1 }
0x157e   :  { %v754_v39 = vpop.permute.xlu1 %753 }
0x157f   :  { %v756_v40 = vadd.f32 %v754_v39, %v746_v38 }
0x1581   :  { %903 = vtanh.f32 %v756_v40 }
0x1587   :  { %v904_v41 = vpop.eup %903 }
0x1588   :  { %759 = vrot.lane.b32.xlu2 %v904_v41, %s931_s1 }
0x15e2   :  { %v760_v42 = vpop.permute.xlu2 %759 }
0x15e3   :  { %v762_v43 = vmul.f32 %v760_v42, %v743_v34 }
0x15e5   :  { %764 = vrot.lane.b32.xlu0 %v762_v43, %s932_s3 }
0x1657   :  { %v765_v36 = vpop.permute.xlu0 %764 }
0x1658   :  { %767 = vst.msk [vmem:[#allocation3] sm:$0xff] %vm27_vm0, %v765_v36 }
0x1659   :  { %778 = dma.vmem_to_hbm [thread:$0]  %s774_s26, 128, %s776_s29, [#allocation4]  }
0x165a   :  { %929 = dma.done.wait [#allocation4], 128  }
0x165b   :  { %930 = vsyncadd [#allocation4], 4294967168 }
0x165c   :  { %783 = vsyncpa [#allocation4], 1 }

</bundles_post_ra>
